<compile_context>
chip_gen: v5e
topology: v5e:2x2
jax: 0.10.0
libtpu: 0.0.40
codegen_flags: <defaults>
</compile_context>

<pallas_src>
import functools

import jax
import jax.numpy as jnp
from jax.experimental import pallas as pl
from jax.experimental.pallas import tpu as pltpu


def _fbeta_kernel(logits_ref, labels_ref, fs_ref, *, beta: float,
                  small_value: float, batch: int):
    """Per-tile kernel: per-row soft F-beta scores, padded rows zeroed."""
    logits = logits_ref[...].astype(jnp.float32)   # (TB, C)
    labels = labels_ref[...].astype(jnp.float32)   # (TB, C)

    tb = logits.shape[0]
    b2 = beta * beta

    p = jax.nn.sigmoid(logits)

    # Row-wise (per-sample) reductions over the class axis (lane axis).
    num_pos = jnp.sum(p, axis=1, keepdims=True) + small_value            # (TB, 1)
    num_pos_hat = jnp.sum(labels, axis=1, keepdims=True) + small_value   # (TB, 1)
    tp = jnp.sum(labels * p, axis=1, keepdims=True)                      # (TB, 1)

    precise = tp / num_pos
    recall = tp / num_pos_hat
    fs = (1.0 + b2) * precise * recall / (b2 * precise + recall + small_value)

    # Mask rows beyond the global batch (ragged last tile reads are undefined).
    row = pl.program_id(0) * tb + jax.lax.broadcasted_iota(jnp.int32, (tb, 1), 0)
    fs_ref[...] = jnp.where(row < batch, fs, 0.0)


def _pick_tile_rows(B: int, C: int, itemsize: int) -> int:
    """Largest batch tile ~<= 2 MiB per input block, aligned to 8 sublanes."""
    target_bytes = 2 * 1024 * 1024
    tb = max(8, target_bytes // max(1, C * itemsize))
    if tb >= B:
        return B                      # full batch in one block
    return max(8, (tb // 8) * 8)      # sublane-aligned partial tile


def fbeta_loss(logits: jax.Array, labels: jax.Array, beta: float = 1.0,
               *, tile_rows: int | None = None) -> jax.Array:
    """Pallas-TPU implementation of FbetaLoss.forward. Returns a scalar float32."""
    assert logits.shape == labels.shape and logits.ndim == 2
    B, C = logits.shape
    small_value = 1e-6

    in_itemsize = jnp.dtype(logits.dtype).itemsize
    lb_itemsize = jnp.dtype(labels.dtype).itemsize

    if tile_rows is None:
        tb = _pick_tile_rows(B, C, in_itemsize)
    else:
        tb = B if tile_rows >= B else max(8, (tile_rows // 8) * 8)

    num_tiles = pl.cdiv(B, tb)

    kernel = functools.partial(
        _fbeta_kernel, beta=float(beta), small_value=small_value, batch=B)

    fs = pl.pallas_call(
        kernel,
        out_shape=jax.ShapeDtypeStruct((B, 1), jnp.float32),
        grid=(num_tiles,),
        in_specs=[
            pl.BlockSpec((tb, C), lambda i: (i, 0)),
            pl.BlockSpec((tb, C), lambda i: (i, 0)),
        ],
        out_specs=pl.BlockSpec((tb, 1), lambda i: (i, 0)),
        compiler_params=pltpu.CompilerParams(
            dimension_semantics=("parallel",)),
        cost_estimate=pl.CostEstimate(
            flops=6 * B * C,
            transcendentals=B * C,
            bytes_accessed=B * C * (in_itemsize + lb_itemsize) + B * 4,
        ),
    )(logits, labels)

    # Tiny final reduction (B floats) outside the kernel keeps the grid axis
    # "parallel" (both v7x TensorCores can stream HBM concurrently).
    loss = jnp.sum(fs) / B
    return 1.0 - loss


def fbeta_loss_ref(logits, labels, beta: float = 1.0, small_value: float = 1e-6):
    """Pure-JAX reference mirroring the PyTorch module (for correctness check)."""
    batch_size = logits.shape[0]
    p = jax.nn.sigmoid(logits).astype(jnp.float32)
    l = labels.astype(jnp.float32)
    num_pos = jnp.sum(p, axis=1) + small_value
    num_pos_hat = jnp.sum(l, axis=1) + small_value
    tp = jnp.sum(l * p, axis=1)
    precise = tp / num_pos
    recall = tp / num_pos_hat
    fs = (1 + beta * beta) * precise * recall / (beta * beta * precise + recall + small_value)
    loss = jnp.sum(fs) / batch_size
    return 1.0 - loss


if __name__ == "__main__":
    key = jax.random.PRNGKey(0)

    # Test 1: small problem, single tile (TB == B).
    k1, k2 = jax.random.split(key)
    B, C = 2, 32
    logits = jax.random.normal(k1, (B, C), dtype=jnp.float32)
    labels = (jax.random.uniform(k2, (B, C)) > 0.5).astype(jnp.float32)
    out = jax.block_until_ready(fbeta_loss(logits, labels, beta=1.0))
    ref = fbeta_loss_ref(logits, labels, beta=1.0)
    assert jnp.allclose(out, ref, atol=1e-5, rtol=1e-5), (out, ref)

    # Test 2: multi-tile grid with a ragged last tile (exercises masking and
    # the "parallel" batch axis). beta != 1 too.
    k3, k4 = jax.random.split(k1)
    B2, C2 = 20, 128
    logits2 = jax.random.normal(k3, (B2, C2), dtype=jnp.float32)
    labels2 = (jax.random.uniform(k4, (B2, C2)) > 0.5).astype(jnp.float32)
    out2 = jax.block_until_ready(fbeta_loss(logits2, labels2, beta=2.0, tile_rows=8))
    ref2 = fbeta_loss_ref(logits2, labels2, beta=2.0)
    assert jnp.allclose(out2, ref2, atol=1e-5, rtol=1e-5), (out2, ref2)

    print("KERNEL_OK")
</pallas_src>

<mosaic_0001>
module attributes {stable_mosaic.version = 11 : i64} {
  func.func @_fbeta_kernel(%arg0: i32, %arg1: memref<2x32xf32, #tpu.memory_space<vmem>>, %arg2: memref<2x32xf32, #tpu.memory_space<vmem>>, %arg3: memref<2x1xf32, #tpu.memory_space<vmem>>) attributes {dimension_semantics = [#tpu.dimension_semantics<parallel>], iteration_bounds = array<i64: 1>, scalar_prefetch = 0 : i64, scratch_operands = 0 : i64, tpu.core_type = #tpu.core_type<tc>, window_params = [{transform_indices = @transform_0, window_bounds = array<i64: 2, 32>}, {transform_indices = @transform_1, window_bounds = array<i64: 2, 32>}, {transform_indices = @transform_2, window_bounds = array<i64: 2, 1>}]} {
    %c0 = arith.constant 0 : index
    %c0_0 = arith.constant 0 : index
    %0 = vector.load %arg1[%c0, %c0_0] : memref<2x32xf32, #tpu.memory_space<vmem>>, vector<2x32xf32>
    %c0_1 = arith.constant 0 : index
    %c0_2 = arith.constant 0 : index
    %1 = vector.load %arg2[%c0_1, %c0_2] : memref<2x32xf32, #tpu.memory_space<vmem>>, vector<2x32xf32>
    %2 = arith.negf %0 : vector<2x32xf32>
    %3 = math.exp %2 : vector<2x32xf32>
    %cst = arith.constant 1.000000e+00 : f32
    %4 = vector.broadcast %cst : f32 to vector<2x32xf32>
    %5 = arith.addf %4, %3 : vector<2x32xf32>
    %6 = arith.divf %4, %5 : vector<2x32xf32>
    %cst_3 = arith.constant dense<0.000000e+00> : vector<2xf32>
    %7 = vector.multi_reduction <add>, %6, %cst_3 [1] : vector<2x32xf32> to vector<2xf32>
    %8 = vector.shape_cast %7 : vector<2xf32> to vector<2x1xf32>
    %cst_4 = arith.constant 9.99999997E-7 : f32
    %9 = vector.broadcast %cst_4 : f32 to vector<2x1xf32>
    %10 = arith.addf %8, %9 : vector<2x1xf32>
    %cst_5 = arith.constant dense<0.000000e+00> : vector<2xf32>
    %11 = vector.multi_reduction <add>, %1, %cst_5 [1] : vector<2x32xf32> to vector<2xf32>
    %12 = vector.shape_cast %11 : vector<2xf32> to vector<2x1xf32>
    %cst_6 = arith.constant 9.99999997E-7 : f32
    %13 = vector.broadcast %cst_6 : f32 to vector<2x1xf32>
    %14 = arith.addf %12, %13 : vector<2x1xf32>
    %15 = arith.mulf %1, %6 : vector<2x32xf32>
    %cst_7 = arith.constant dense<0.000000e+00> : vector<2xf32>
    %16 = vector.multi_reduction <add>, %15, %cst_7 [1] : vector<2x32xf32> to vector<2xf32>
    %17 = vector.shape_cast %16 : vector<2xf32> to vector<2x1xf32>
    %18 = arith.divf %17, %10 : vector<2x1xf32>
    %19 = arith.divf %17, %14 : vector<2x1xf32>
    %cst_8 = arith.constant 2.000000e+00 : f32
    %20 = vector.broadcast %cst_8 : f32 to vector<2x1xf32>
    %21 = arith.mulf %20, %18 : vector<2x1xf32>
    %22 = arith.mulf %21, %19 : vector<2x1xf32>
    %cst_9 = arith.constant 1.000000e+00 : f32
    %23 = vector.broadcast %cst_9 : f32 to vector<2x1xf32>
    %24 = arith.mulf %23, %18 : vector<2x1xf32>
    %25 = arith.addf %24, %19 : vector<2x1xf32>
    %cst_10 = arith.constant 9.99999997E-7 : f32
    %26 = vector.broadcast %cst_10 : f32 to vector<2x1xf32>
    %27 = arith.addf %25, %26 : vector<2x1xf32>
    %28 = arith.divf %22, %27 : vector<2x1xf32>
    %c2_i32 = arith.constant 2 : i32
    %29 = arith.muli %arg0, %c2_i32 : i32
    %30 = tpu.iota {dimensions = array<i32: 0>} : vector<2x1xi32>
    %31 = vector.broadcast %29 : i32 to vector<2x1xi32>
    %32 = arith.addi %31, %30 : vector<2x1xi32>
    %c2_i32_11 = arith.constant 2 : i32
    %33 = vector.broadcast %c2_i32_11 : i32 to vector<2x1xi32>
    %34 = arith.cmpi slt, %32, %33 : vector<2x1xi32>
    %cst_12 = arith.constant 0.000000e+00 : f32
    %35 = vector.broadcast %cst_12 : f32 to vector<2x1xf32>
    %36 = arith.select %34, %28, %35 : vector<2x1xi1>, vector<2x1xf32>
    %c0_13 = arith.constant 0 : index
    %c0_14 = arith.constant 0 : index
    %37 = vector.load %arg3[%c0_13, %c0_14] : memref<2x1xf32, #tpu.memory_space<vmem>>, vector<2x1xf32>
    tpu.vector_store %arg3[%c0_13, %c0_14], %36 {strides = array<i32>} : memref<2x1xf32, #tpu.memory_space<vmem>>, vector<2x1xf32>,
    return
  }
  func.func @transform_0(%arg0: i32) -> (i32, i32) {
    %c0_i32 = arith.constant 0 : i32
    %c0_i32_0 = arith.constant 0 : i32
    return %arg0, %c0_i32 : i32, i32
  }
  func.func @transform_1(%arg0: i32) -> (i32, i32) {
    %c0_i32 = arith.constant 0 : i32
    %c0_i32_0 = arith.constant 0 : i32
    return %arg0, %c0_i32 : i32, i32
  }
  func.func @transform_2(%arg0: i32) -> (i32, i32) {
    %c0_i32 = arith.constant 0 : i32
    %c0_i32_0 = arith.constant 0 : i32
    return %arg0, %c0_i32 : i32, i32
  }
}

</mosaic_0001>

<bundles_post_ra>
// kernel: tpu_custom_call.1
= control target key start
LH: loop header
LB: loop body
LE: loop exit
PB: predicated region body
PF: predicated region fallthrough
CT: control target
= control target key end

     0   :  { %7 = vsyncpa [#allocation3], 0  ;;  %s228_s0 = inlined_call_operand.hbm [shape: f32[2,32], index: 0, kind: input, shape index: {}]   ;;  %s229_s1 = inlined_call_operand.hbm [shape: f32[2,32], index: 1, kind: input, shape index: {}]   ;;  %s230_s2 = inlined_call_operand.vmem [shape: f32[2,1], index: 2, kind: output, shape index: {}]  }
   0x1   :  { %s14_s11 = sshll.u32 %s228_s0, 4  ;;  %s15_s11 = int_to_ptr.hbm [resolvable:$true] %s14_s11 }
   0x2   :  { %8 = vsyncpa [#allocation5], 0  ;;  %s202_s12 = smov [#allocation2]   ;;  %s25_s16 = sshll.u32 %s229_s1, 4  ;;  %s26_s16 = int_to_ptr.hbm [resolvable:$true] %s25_s16 }
   0x3   :  { %s16_s13 = sshll.u32 %s202_s12, 4  ;;  %s203_s17 = smov [#allocation4]   ;;  %s17_s13 = int_to_ptr.vmem [resolvable:$true] %s16_s13 }
   0x4   :  { %19 = dma.hbm_to_vmem [thread:$0]  %s15_s11, 32, %s17_s13, [#allocation3]  }
   0x5   :  { %s27_s18 = sshll.u32 %s203_s17, 4  ;;  %s28_s18 = int_to_ptr.vmem [resolvable:$true] %s27_s18 }
   0x6   :  { %30 = dma.hbm_to_vmem [thread:$0]  %s26_s16, 32, %s28_s18, [#allocation5]  }
   0x7   :  { %198 = dma.done.wait [#allocation3], 32  }
   0x8   :  { %199 = vsyncadd [#allocation3], 4294967264 }
   0x9   :  { %200 = dma.done.wait [#allocation5], 32  }
   0xa   :  { %201 = vsyncadd [#allocation5], 4294967264  ;;  %v39_v0 = vld [vmem:[#allocation2] sm:$0x3]  ;;  %vm60_vm4 = vcmask 254976   ;;  %v123_v50 = vlaneseq }
   0xb   :  { %v137_v1 = vmul.f32 -1.442695, %v39_v0  ;;  %v40_v14 = vld [vmem:[#allocation4] sm:$0x3] }
   0xc   :  { %v65_v18 = vsel %vm60_vm4, %v40_v14, 0.0  ;;  %v124_v55 = vshrl.u32 %v123_v50, 7 }
   0xd   :  { %140 = vpow2.f32 %v137_v1 }
  0x13   :  { %v141_v2 = vpop.eup %140 }
  0x14   :  { %v44_v3 = vadd.f32 1.0, %v141_v2 }
  0x16   :  { %142 = vrcp.f32 %v44_v3  ;;  %v56_v6 = vand.u32 2147483648, %v44_v3  ;;  %vm50_vm0 = vweird.f32 %v44_v3  ;;  %v54_v8 = vand.u32 2147483647, %v44_v3 }
  0x18   :  { %v57_v10 = vor.u32 1.1754944e-38, %v56_v6  ;;  %vm55_vm3 = vcmp.eq.f32.partialorder %v54_v8, 8.507059e+37 }
  0x1c   :  { %v143_v4 = vpop.eup %142 }
  0x1d   :  { %v46_v5 = vmul.f32 %v143_v4, %v44_v3  ;;  %vm51_vm1 = vweird.f32 %v143_v4 }
  0x1e   :  { %vm52_vm2 = vmor %vm50_vm0, %vm51_vm1  ;;  %vm127_vm1 = vcmp.lt.s32.totalorder %v124_v55, 2 }
  0x1f   :  { %v47_v7 = vsub.f32 1.0, %v46_v5 }
  0x21   :  { %v48_v9 = vmul.f32 %v143_v4, %v47_v7 }
  0x23   :  { %v49_v11 = vadd.f32 %v143_v4, %v48_v9 }
  0x25   :  { %v53_v12 = vsel %vm52_vm2, %v143_v4, %v49_v11  ;;  %vm129_vm2 = vcmask 1024  }
  0x26   :  { %v58_v13 = vsel %vm55_vm3, %v57_v10, %v53_v12 }
  0x27   :  { %v61_v15 = vsel %vm60_vm4, %v58_v13, 0.0  ;;  %v69_v16 = vmul.f32 %v58_v13, %v40_v14 }
  0x28   :  { %62 = vadd.xlane.f32.xlu0 %v61_v15 }
  0x29   :  { %v70_v17 = vsel %vm60_vm4, %v69_v16, 0.0 }
  0x2a   :  { %71 = vadd.xlane.f32.xlu1 %v70_v17 }
  0x30   :  { %66 = vadd.xlane.f32.xlu0 %v65_v18 }
  0x9b   :  { %v63_v19 = vpop.xlane.xlu0 %62 }
  0x9c   :  { %v64_v20 = vadd.f32 1e-06, %v63_v19 }
  0x9d   :  { %v72_v39 = vpop.xlane.xlu1 %71 }
  0x9e   :  { %144 = vrcp.f32 %v64_v20  ;;  %v84_v30 = vand.u32 2147483648, %v64_v20  ;;  %vm78_vm6 = vweird.f32 %v64_v20  ;;  %v82_v31 = vand.u32 2147483647, %v64_v20 }
  0xa0   :  { %v85_v37 = vor.u32 1.1754944e-38, %v84_v30  ;;  %vm83_vm9 = vcmp.eq.f32.partialorder %v82_v31, 8.507059e+37 }
  0xa3   :  { %v67_v21 = vpop.xlane.xlu0 %66 }
  0xa4   :  { %v145_v22 = vpop.eup %144  ;;  %v68_v23 = vadd.f32 1e-06, %v67_v21 }
  0xa5   :  { %v74_v24 = vmul.f32 %v145_v22, %v64_v20  ;;  %vm79_vm5 = vweird.f32 %v145_v22 }
  0xa6   :  { %146 = vrcp.f32 %v68_v23  ;;  %vm80_vm7 = vmor %vm78_vm6, %vm79_vm5  ;;  %v99_v33 = vand.u32 2147483648, %v68_v23  ;;  %v97_v36 = vand.u32 2147483647, %v68_v23  ;;  %vm93_vm10 = vweird.f32 %v68_v23 }
  0xa7   :  { %v75_v25 = vsub.f32 1.0, %v74_v24 }
  0xa8   :  { %v100_v41 = vor.u32 1.1754944e-38, %v99_v33  ;;  %vm98_vm12 = vcmp.eq.f32.partialorder %v97_v36, 8.507059e+37 }
  0xa9   :  { %v76_v26 = vmul.f32 %v145_v22, %v75_v25 }
  0xab   :  { %v77_v29 = vadd.f32 %v145_v22, %v76_v26 }
  0xac   :  { %v147_v27 = vpop.eup %146 }
  0xad   :  { %v89_v28 = vmul.f32 %v147_v27, %v68_v23  ;;  %v81_v34 = vsel %vm80_vm7, %v145_v22, %v77_v29  ;;  %vm94_vm8 = vweird.f32 %v147_v27 }
  0xae   :  { %v86_v40 = vsel %vm83_vm9, %v85_v37, %v81_v34  ;;  %vm95_vm11 = vmor %vm93_vm10, %vm94_vm8 }
  0xaf   :  { %v90_v32 = vsub.f32 1.0, %v89_v28  ;;  %v87_v44 = vmul.f32 %v86_v40, %v72_v39 }
  0xb1   :  { %v91_v35 = vmul.f32 %v147_v27, %v90_v32  ;;  %v103_v56 = vmul.f32 2.0, %v87_v44 }
  0xb3   :  { %v92_v38 = vadd.f32 %v147_v27, %v91_v35 }
  0xb5   :  { %v96_v42 = vsel %vm95_vm11, %v147_v27, %v92_v38 }
  0xb6   :  { %v101_v43 = vsel %vm98_vm12, %v100_v41, %v96_v42 }
  0xb7   :  { %v102_v45 = vmul.f32 %v101_v43, %v72_v39 }
  0xb9   :  { %v105_v46 = vadd.f32 %v102_v45, %v87_v44  ;;  %v104_v59 = vmul.f32 %v103_v56, %v102_v45 }
  0xbb   :  { %v106_v47 = vadd.f32 1e-06, %v105_v46 }
  0xbd   :  { %148 = vrcp.f32 %v106_v47  ;;  %v118_v52 = vand.u32 2147483648, %v106_v47  ;;  %v116_v54 = vand.u32 2147483647, %v106_v47  ;;  %vm112_vm14 = vweird.f32 %v106_v47 }
  0xbf   :  { %v119_v58 = vor.u32 1.1754944e-38, %v118_v52  ;;  %vm117_vm0 = vcmp.eq.f32.partialorder %v116_v54, 8.507059e+37 }
  0xc3   :  { %v149_v48 = vpop.eup %148 }
  0xc4   :  { %v108_v49 = vmul.f32 %v149_v48, %v106_v47  ;;  %vm113_vm13 = vweird.f32 %v149_v48 }
  0xc5   :  { %vm114_vm15 = vmor %vm112_vm14, %vm113_vm13 }
  0xc6   :  { %v109_v51 = vsub.f32 1.0, %v108_v49 }
  0xc8   :  { %v110_v53 = vmul.f32 %v149_v48, %v109_v51 }
  0xca   :  { %v111_v57 = vadd.f32 %v149_v48, %v110_v53 }
  0xcc   :  { %v115_v60 = vsel %vm114_vm15, %v149_v48, %v111_v57 }
  0xcd   :  { %v120_v61 = vsel %vm117_vm0, %v119_v58, %v115_v60 }
  0xce   :  { %v121_v62 = vmul.f32 %v120_v61, %v104_v59 }
  0xd0   :  { %v128_v63 = vsel %vm127_vm1, %v121_v62, 0.0 }
  0xd1   :  { %130 = vst.msk [vmem:[%s230_s2] sm:$0x3] %vm129_vm2, %v128_v63 }
  0xd2   :  { %135 = vsyncpa [#allocation3], 1 }
  0xd3   :  { %136 = vsyncpa [#allocation5], 1 }

</bundles_post_ra>
